<compile_context>
chip_gen: v5e
topology: v5e:2x2
jax: 0.10.0
libtpu: 0.0.40
codegen_flags: <defaults>
</compile_context>

<pallas_src>
import functools

import jax
import jax.numpy as jnp
import numpy as np
from jax.experimental import pallas as pl
from jax.experimental.pallas import tpu as pltpu

_LANES = 128
_SUBLANE_ALIGN = 64                 # multiple of the sublane packing of f32/bf16/int8
_MAX_TILE_SUBLANES = 2048
_TILE_F32_BYTES = 2 * 1024 * 1024   # target bytes of one (C, T, 128) f32 working tile


def _dice_sums_kernel(x_ref, lab_ref, out_ref, *, apply_softmax, needs_mask):
    """Accumulates per-lane partial sums of (intersect, y_sum, z_sum)."""
    first = (pl.program_id(0) == 0) & (pl.program_id(1) == 0)

    @pl.when(first)
    def _():
        out_ref[...] = jnp.zeros_like(out_ref)

    x = x_ref[0].astype(jnp.float32)        # (C, T, 128); native-dtype DMA, cast in VMEM
    lab = lab_ref[0].astype(jnp.int32)      # (T, 128); -1 == ignored / padded pixel

    if apply_softmax:
        # softmax over the class axis (torch.softmax(inputs, dim=1))
        m = jnp.max(x, axis=0, keepdims=True)
        e = jnp.exp(x - m)
        denom = jnp.sum(e, axis=0, keepdims=True)
        # one reciprocal + broadcast multiply instead of C divides
        x = e * pl.reciprocal(denom, approx=False)

    cls_ids = jax.lax.broadcasted_iota(jnp.int32, x.shape, 0)   # (C, T, 128)
    # one-hot targets; label -1 matches no class, so ignored pixels are
    # already excluded from intersect / y_sum.
    onehot = (lab[None, :, :] == cls_ids).astype(jnp.float32)

    sq = x * x
    if needs_mask:
        keep = (lab >= 0).astype(jnp.float32)                   # (T, 128)
        sq = sq * keep[None, :, :]

    # Sublane-only reductions; the lane axis is collapsed once in the wrapper.
    out_ref[0, :, :] += jnp.sum(x * onehot, axis=1)             # intersect
    out_ref[1, :, :] += jnp.sum(onehot, axis=1)                 # y_sum (t*t == t for 0/1)
    out_ref[2, :, :] += jnp.sum(sq, axis=1)                     # z_sum


def _pick_tile(s, n_classes, tile_sublanes_cap=None):
    """Largest aligned sublane tile whose f32 working set stays ~_TILE_F32_BYTES."""
    cap = _TILE_F32_BYTES // (n_classes * _LANES * 4)
    cap = max(_SUBLANE_ALIGN, (cap // _SUBLANE_ALIGN) * _SUBLANE_ALIGN)
    cap = min(cap, _MAX_TILE_SUBLANES)
    if tile_sublanes_cap is not None:
        user_cap = max(_SUBLANE_ALIGN,
                       (int(tile_sublanes_cap) // _SUBLANE_ALIGN) * _SUBLANE_ALIGN)
        cap = min(cap, user_cap)
    if s <= cap:
        return s, s                        # whole spatial extent in one step
    s_pad = pl.cdiv(s, cap) * cap
    return cap, s_pad


def dice_loss(inputs, target, n_classes, weight=None, softmax=False,
              ignore=None, tile_sublanes_cap=None):
    """Pallas implementation of DiceLoss.forward.

    inputs: (B, C, H, W) float logits/probs (any float dtype; not upcast on host)
    target: (B, 1, H, W) integer class labels
    ignore: optional (B, H, W); value == 1 means "exclude pixel from all sums"
    """
    B, C, H, W = inputs.shape
    assert C == n_classes, "predict & target shape do not match"

    labels = jnp.squeeze(target, axis=1).astype(jnp.int32)      # (B, H, W)
    if ignore is not None:
        # Fold the ignore mask into the labels: ignored pixels get label -1,
        # which matches no class and is dropped from z_sum via the keep mask.
        labels = jnp.where(ignore.astype(jnp.int32) == 1, jnp.int32(-1), labels)
    # Stream labels at 1 byte/pixel whenever class ids fit (always true for
    # segmentation); falls back to int32 otherwise.
    lab_dtype = jnp.int8 if n_classes < 127 else jnp.int32
    labels = labels.astype(lab_dtype)

    if weight is None:
        weight = [1.0] * n_classes
    weight = jnp.asarray(weight, jnp.float32)

    # ---- lane-dense spatial layout: (B, C, S, 128) / (B, S, 128) ------------
    hw = H * W
    s = pl.cdiv(hw, _LANES)                       # sublane rows after flattening
    t_sub, s_pad = _pick_tile(s, n_classes, tile_sublanes_cap)
    padded_hw = s_pad * _LANES
    needs_mask = (ignore is not None) or (padded_hw != hw)

    x_flat = inputs.reshape(B, C, hw)             # keep native dtype (bf16 stays bf16)
    lab_flat = labels.reshape(B, hw)
    if padded_hw != hw:
        pad = padded_hw - hw
        x_flat = jnp.pad(x_flat, ((0, 0), (0, 0), (0, pad)))
        lab_flat = jnp.pad(lab_flat, ((0, 0), (0, pad)), constant_values=-1)
    x_tiled = x_flat.reshape(B, C, s_pad, _LANES)
    lab_tiled = lab_flat.reshape(B, s_pad, _LANES)

    kernel = functools.partial(_dice_sums_kernel,
                               apply_softmax=softmax, needs_mask=needs_mask)

    lane_sums = pl.pallas_call(
        kernel,
        out_shape=jax.ShapeDtypeStruct((3, n_classes, _LANES), jnp.float32),
        grid_spec=pltpu.PrefetchScalarGridSpec(
            num_scalar_prefetch=0,
            grid=(B, s_pad // t_sub),
            in_specs=[
                pl.BlockSpec((1, C, t_sub, _LANES), lambda b, t: (b, 0, t, 0)),
                pl.BlockSpec((1, t_sub, _LANES), lambda b, t: (b, t, 0)),
            ],
            # Constant output block index -> the block stays resident in VMEM
            # and doubles as the accumulator; written back to HBM once.
            out_specs=pl.BlockSpec((3, n_classes, _LANES),
                                   lambda b, t: (0, 0, 0)),
        ),
        compiler_params=pltpu.CompilerParams(
            dimension_semantics=("arbitrary", "arbitrary"),
            vmem_limit_bytes=32 * 1024 * 1024),
    )(x_tiled, lab_tiled)

    sums = jnp.sum(lane_sums, axis=-1)            # (3, C): single cross-lane reduce
    intersect, y_sum, z_sum = sums[0], sums[1], sums[2]
    smooth = 0.0001
    dice = (2.0 * intersect + smooth) / (z_sum + y_sum + smooth)
    per_class_loss = 1.0 - dice                   # "1 - loss" in _dice_loss
    return jnp.sum(per_class_loss * weight) / n_classes


def _dice_loss_ref(inputs, target, n_classes, weight=None, softmax=False,
                   ignore=None):
    """Pure-JAX reference mirroring the PyTorch module (for verification)."""
    inputs = inputs.astype(jnp.float32)
    if softmax:
        inputs = jax.nn.softmax(inputs, axis=1)
    labels = jnp.squeeze(target, axis=1).astype(jnp.int32)
    onehot = (labels[:, None, :, :] ==
              jnp.arange(n_classes)[None, :, None, None]).astype(jnp.float32)
    if ignore is None:
        keep = jnp.ones(labels.shape, jnp.float32)
    else:
        keep = (ignore != 1).astype(jnp.float32)
    if weight is None:
        weight = [1.0] * n_classes
    weight = jnp.asarray(weight, jnp.float32)
    smooth = 0.0001
    loss = 0.0
    for i in range(n_classes):
        s = inputs[:, i] * keep
        t = onehot[:, i] * keep
        inter = jnp.sum(s * t)
        y = jnp.sum(t * t)
        z = jnp.sum(s * s)
        dice = 1.0 - (2.0 * inter + smooth) / (z + y + smooth)
        loss = loss + dice * weight[i]
    return loss / n_classes


if __name__ == "__main__":
    key = jax.random.PRNGKey(0)
    k1, k2, k3 = jax.random.split(key, 3)

    B, C, H, W = 2, 4, 16, 16
    inputs = jax.random.normal(k1, (B, C, H, W), dtype=jnp.float32)
    target = jax.random.randint(k2, (B, 1, H, W), 0, C, dtype=jnp.int32)
    ignore = (jax.random.uniform(k3, (B, H, W)) < 0.2).astype(jnp.int32)

    # 1) softmax + ignore + non-default per-class weights (f32 inputs)
    w = [1.0, 2.0, 0.5, 1.5]
    loss = jax.block_until_ready(
        dice_loss(inputs, target, n_classes=C, weight=w, softmax=True,
                  ignore=ignore))
    ref = _dice_loss_ref(inputs, target, C, weight=w, softmax=True,
                         ignore=ignore)
    np.testing.assert_allclose(np.asarray(loss), np.asarray(ref),
                               rtol=1e-4, atol=1e-5)

    # 2) default path: no softmax, no ignore, default weights (mask skipped)
    loss2 = jax.block_until_ready(dice_loss(inputs, target, n_classes=C))
    ref2 = _dice_loss_ref(inputs, target, C)
    np.testing.assert_allclose(np.asarray(loss2), np.asarray(ref2),
                               rtol=1e-4, atol=1e-5)

    # 3) native bf16 inputs are streamed without any host-side upcast
    inputs_bf16 = inputs.astype(jnp.bfloat16)
    loss3 = jax.block_until_ready(
        dice_loss(inputs_bf16, target, n_classes=C, softmax=True,
                  ignore=ignore))
    ref3 = _dice_loss_ref(inputs_bf16, target, C, softmax=True, ignore=ignore)
    np.testing.assert_allclose(np.asarray(loss3), np.asarray(ref3),
                               rtol=1e-4, atol=1e-4)

    # 4) non-128-multiple spatial size -> exercises padding + keep mask
    Hp = Wp = 20
    k4, k5 = jax.random.split(k3)
    inputs_p = jax.random.normal(k4, (B, C, Hp, Wp), dtype=jnp.float32)
    target_p = jax.random.randint(k5, (B, 1, Hp, Wp), 0, C, dtype=jnp.int32)
    loss4 = jax.block_until_ready(
        dice_loss(inputs_p, target_p, n_classes=C, softmax=True))
    ref4 = _dice_loss_ref(inputs_p, target_p, C, softmax=True)
    np.testing.assert_allclose(np.asarray(loss4), np.asarray(ref4),
                               rtol=1e-4, atol=1e-5)

    # 5) force multi-step spatial tiling to exercise grid accumulation
    Hb = Wb = 96
    k6, k7 = jax.random.split(k4)
    inputs_b = jax.random.normal(k6, (B, C, Hb, Wb), dtype=jnp.float32)
    target_b = jax.random.randint(k7, (B, 1, Hb, Wb), 0, C, dtype=jnp.int32)
    loss5 = jax.block_until_ready(
        dice_loss(inputs_b, target_b, n_classes=C, softmax=True,
                  tile_sublanes_cap=64))
    ref5 = _dice_loss_ref(inputs_b, target_b, C, softmax=True)
    np.testing.assert_allclose(np.asarray(loss5), np.asarray(ref5),
                               rtol=1e-4, atol=1e-5)

    print("KERNEL_OK")
</pallas_src>

<mosaic_0001>
module attributes {stable_mosaic.version = 11 : i64} {
  func.func @_dice_sums_kernel(%arg0: i32, %arg1: i32, %arg2: memref<1x4x2x128xf32, #tpu.memory_space<vmem>>, %arg3: memref<1x2x128xi8, #tpu.memory_space<vmem>>, %arg4: memref<3x4x128xf32, #tpu.memory_space<vmem>>) attributes {dimension_semantics = [#tpu.dimension_semantics<arbitrary>, #tpu.dimension_semantics<arbitrary>], iteration_bounds = array<i64: 2, 1>, scalar_prefetch = 0 : i64, scratch_operands = 0 : i64, tpu.core_type = #tpu.core_type<tc>, window_params = [{transform_indices = @transform_0, window_bounds = array<i64: 1, 4, 2, 128>}, {transform_indices = @transform_1, window_bounds = array<i64: 1, 2, 128>}, {pipeline_mode = #tpu.pipeline_mode<synchronous>, transform_indices = @transform_2, window_bounds = array<i64: 3, 4, 128>}]} {
    %c0_i32 = arith.constant 0 : i32
    %0 = arith.cmpi eq, %arg0, %c0_i32 : i32
    %c0_i32_0 = arith.constant 0 : i32
    %1 = arith.cmpi eq, %arg1, %c0_i32_0 : i32
    %2 = arith.andi %0, %1 : i1
    %3 = arith.extui %2 : i1 to i32
    %c0_i32_1 = arith.constant 0 : i32
    %4 = arith.cmpi ne, %3, %c0_i32_1 : i32
    scf.if %4 {
      %cst_29 = arith.constant 0.000000e+00 : f32
      %56 = vector.broadcast %cst_29 : f32 to vector<3x4x128xf32>
      %c0_30 = arith.constant 0 : index
      %c0_31 = arith.constant 0 : index
      %c0_32 = arith.constant 0 : index
      %57 = vector.load %arg4[%c0_30, %c0_31, %c0_32] : memref<3x4x128xf32, #tpu.memory_space<vmem>>, vector<3x4x128xf32>
      tpu.vector_store %arg4[%c0_30, %c0_31, %c0_32], %56 {strides = array<i32>} : memref<3x4x128xf32, #tpu.memory_space<vmem>>, vector<3x4x128xf32>,
    } else {
    }
    %c0 = arith.constant 0 : index
    %c0_2 = arith.constant 0 : index
    %c0_3 = arith.constant 0 : index
    %c0_4 = arith.constant 0 : index
    %5 = vector.load %arg2[%c0, %c0_2, %c0_3, %c0_4] : memref<1x4x2x128xf32, #tpu.memory_space<vmem>>, vector<1x4x2x128xf32>
    %6 = vector.shape_cast %5 : vector<1x4x2x128xf32> to vector<4x2x128xf32>
    %c0_5 = arith.constant 0 : index
    %c0_6 = arith.constant 0 : index
    %c0_7 = arith.constant 0 : index
    %7 = vector.load %arg3[%c0_5, %c0_6, %c0_7] : memref<1x2x128xi8, #tpu.memory_space<vmem>>, vector<1x2x128xi8>
    %8 = vector.shape_cast %7 : vector<1x2x128xi8> to vector<2x128xi8>
    %9 = arith.extsi %8 : vector<2x128xi8> to vector<2x128xi32>
    %cst = arith.constant dense<0xFF800000> : vector<2x128xf32>
    %10 = vector.multi_reduction <maximumf>, %6, %cst [0] : vector<4x2x128xf32> to vector<2x128xf32>
    %11 = vector.shape_cast %10 : vector<2x128xf32> to vector<1x2x128xf32>
    %12 = vector.broadcast %11 : vector<1x2x128xf32> to vector<4x2x128xf32>
    %13 = arith.subf %6, %12 : vector<4x2x128xf32>
    %14 = math.exp %13 : vector<4x2x128xf32>
    %cst_8 = arith.constant dense<0.000000e+00> : vector<2x128xf32>
    %15 = vector.multi_reduction <add>, %14, %cst_8 [0] : vector<4x2x128xf32> to vector<2x128xf32>
    %16 = vector.shape_cast %15 : vector<2x128xf32> to vector<1x2x128xf32>
    %17 = tpu.reciprocal %16 : vector<1x2x128xf32> -> vector<1x2x128xf32>
    %18 = vector.broadcast %17 : vector<1x2x128xf32> to vector<4x2x128xf32>
    %19 = arith.mulf %14, %18 : vector<4x2x128xf32>
    %20 = tpu.iota {dimensions = array<i32: 0>} : vector<4x2x128xi32>
    %21 = vector.shape_cast %9 : vector<2x128xi32> to vector<1x2x128xi32>
    %22 = vector.broadcast %21 : vector<1x2x128xi32> to vector<4x2x128xi32>
    %23 = arith.cmpi eq, %22, %20 : vector<4x2x128xi32>
    %24 = arith.extui %23 : vector<4x2x128xi1> to vector<4x2x128xi32>
    %25 = arith.sitofp %24 : vector<4x2x128xi32> to vector<4x2x128xf32>
    %26 = arith.mulf %19, %19 : vector<4x2x128xf32>
    %c0_i32_9 = arith.constant 0 : i32
    %27 = vector.broadcast %c0_i32_9 : i32 to vector<2x128xi32>
    %28 = arith.cmpi sge, %9, %27 : vector<2x128xi32>
    %29 = arith.extui %28 : vector<2x128xi1> to vector<2x128xi32>
    %30 = arith.sitofp %29 : vector<2x128xi32> to vector<2x128xf32>
    %31 = vector.shape_cast %30 : vector<2x128xf32> to vector<1x2x128xf32>
    %32 = vector.broadcast %31 : vector<1x2x128xf32> to vector<4x2x128xf32>
    %33 = arith.mulf %26, %32 : vector<4x2x128xf32>
    %c0_10 = arith.constant 0 : index
    %c0_11 = arith.constant 0 : index
    %c0_12 = arith.constant 0 : index
    %34 = vector.load %arg4[%c0_10, %c0_11, %c0_12] : memref<3x4x128xf32, #tpu.memory_space<vmem>>, vector<1x4x128xf32>
    %35 = vector.shape_cast %34 : vector<1x4x128xf32> to vector<4x128xf32>
    %36 = arith.mulf %19, %25 : vector<4x2x128xf32>
    %cst_13 = arith.constant dense<0.000000e+00> : vector<4x128xf32>
    %37 = vector.multi_reduction <add>, %36, %cst_13 [1] : vector<4x2x128xf32> to vector<4x128xf32>
    %38 = arith.addf %35, %37 : vector<4x128xf32>
    %c0_14 = arith.constant 0 : index
    %c0_15 = arith.constant 0 : index
    %c0_16 = arith.constant 0 : index
    %39 = vector.load %arg4[%c0_14, %c0_15, %c0_16] : memref<3x4x128xf32, #tpu.memory_space<vmem>>, vector<1x4x128xf32>
    %40 = vector.shape_cast %39 : vector<1x4x128xf32> to vector<4x128xf32>
    %41 = vector.shape_cast %38 : vector<4x128xf32> to vector<1x4x128xf32>
    tpu.vector_store %arg4[%c0_14, %c0_15, %c0_16], %41 {strides = array<i32>} : memref<3x4x128xf32, #tpu.memory_space<vmem>>, vector<1x4x128xf32>,
    %c1 = arith.constant 1 : index
    %c0_17 = arith.constant 0 : index
    %c0_18 = arith.constant 0 : index
    %42 = vector.load %arg4[%c1, %c0_17, %c0_18] : memref<3x4x128xf32, #tpu.memory_space<vmem>>, vector<1x4x128xf32>
    %43 = vector.shape_cast %42 : vector<1x4x128xf32> to vector<4x128xf32>
    %cst_19 = arith.constant dense<0.000000e+00> : vector<4x128xf32>
    %44 = vector.multi_reduction <add>, %25, %cst_19 [1] : vector<4x2x128xf32> to vector<4x128xf32>
    %45 = arith.addf %43, %44 : vector<4x128xf32>
    %c1_20 = arith.constant 1 : index
    %c0_21 = arith.constant 0 : index
    %c0_22 = arith.constant 0 : index
    %46 = vector.load %arg4[%c1_20, %c0_21, %c0_22] : memref<3x4x128xf32, #tpu.memory_space<vmem>>, vector<1x4x128xf32>
    %47 = vector.shape_cast %46 : vector<1x4x128xf32> to vector<4x128xf32>
    %48 = vector.shape_cast %45 : vector<4x128xf32> to vector<1x4x128xf32>
    tpu.vector_store %arg4[%c1_20, %c0_21, %c0_22], %48 {strides = array<i32>} : memref<3x4x128xf32, #tpu.memory_space<vmem>>, vector<1x4x128xf32>,
    %c2 = arith.constant 2 : index
    %c0_23 = arith.constant 0 : index
    %c0_24 = arith.constant 0 : index
    %49 = vector.load %arg4[%c2, %c0_23, %c0_24] : memref<3x4x128xf32, #tpu.memory_space<vmem>>, vector<1x4x128xf32>
    %50 = vector.shape_cast %49 : vector<1x4x128xf32> to vector<4x128xf32>
    %cst_25 = arith.constant dense<0.000000e+00> : vector<4x128xf32>
    %51 = vector.multi_reduction <add>, %33, %cst_25 [1] : vector<4x2x128xf32> to vector<4x128xf32>
    %52 = arith.addf %50, %51 : vector<4x128xf32>
    %c2_26 = arith.constant 2 : index
    %c0_27 = arith.constant 0 : index
    %c0_28 = arith.constant 0 : index
    %53 = vector.load %arg4[%c2_26, %c0_27, %c0_28] : memref<3x4x128xf32, #tpu.memory_space<vmem>>, vector<1x4x128xf32>
    %54 = vector.shape_cast %53 : vector<1x4x128xf32> to vector<4x128xf32>
    %55 = vector.shape_cast %52 : vector<4x128xf32> to vector<1x4x128xf32>
    tpu.vector_store %arg4[%c2_26, %c0_27, %c0_28], %55 {strides = array<i32>} : memref<3x4x128xf32, #tpu.memory_space<vmem>>, vector<1x4x128xf32>,
    return
  }
  func.func @transform_0(%arg0: i32, %arg1: i32) -> (i32, i32, i32, i32) {
    %c0_i32 = arith.constant 0 : i32
    %c0_i32_0 = arith.constant 0 : i32
    %c0_i32_1 = arith.constant 0 : i32
    return %arg0, %c0_i32, %arg1, %c0_i32_0 : i32, i32, i32, i32
  }
  func.func @transform_1(%arg0: i32, %arg1: i32) -> (i32, i32, i32) {
    %c0_i32 = arith.constant 0 : i32
    %c0_i32_0 = arith.constant 0 : i32
    return %arg0, %arg1, %c0_i32 : i32, i32, i32
  }
  func.func @transform_2(%arg0: i32, %arg1: i32) -> (i32, i32, i32) {
    %c0_i32 = arith.constant 0 : i32
    %c0_i32_0 = arith.constant 0 : i32
    %c0_i32_1 = arith.constant 0 : i32
    %c0_i32_2 = arith.constant 0 : i32
    return %c0_i32, %c0_i32_0, %c0_i32_1 : i32, i32, i32
  }
}

</mosaic_0001>

<bundles_post_ra>
// kernel: tpu_custom_call.1
= control target key start
LH: loop header
LB: loop body
LE: loop exit
PB: predicated region body
PF: predicated region fallthrough
CT: control target
= control target key end

     0   :  { %7 = vsyncpa [#allocation3], 0  ;;  %s953_s0 = inlined_call_operand.hbm [shape: f32[2,4,2,128], index: 0, kind: input, shape index: {}]   ;;  %s954_s1 = inlined_call_operand.hbm [shape: s8[2,2,128], index: 1, kind: input, shape index: {}]   ;;  %s955_s2 = inlined_call_operand.hbm [shape: f32[3,4,128], index: 2, kind: output, shape index: {}]  }
   0x1   :  { %9 = vsyncpa [#allocation3 + $0x1], 0 }
   0x2   :  { %10 = vsyncpa [#allocation6], 0 }
   0x3   :  { %12 = vsyncpa [#allocation6 + $0x1], 0 }
   0x4   :  { %13 = vsyncpa [#allocation4], 0  ;;  %s779_s9 = smov 0   ;;  %s781_s10 = smov 0  }
   0x5   :  { %s783_s11 = smov 0   ;;  %s785_s12 = smov 0  }
   0x6   :  { %s787_s13 = smov 0   ;;  %s789_s14 = smov 0  }
   0x7 LB: > { %s506_s15 = sadd.s32 4294967295, %s755_s14   ;;  %s31_s16 = sadd.s32 1, %s751_s13  ;;  %s755_s14 = sphi %s789_s14, %s19_s14   ;;  %s751_s13 = sphi %s787_s13, %s963_s13   ;;  %s747_s12 = sphi %s785_s12, %s962_s12   ;;  %s743_s11 = sphi %s783_s11, %s961_s11   ;;  %s739_s10 = sphi %s781_s10, %s960_s10   ;;  %s735_s9 = sphi %s779_s9, %s959_s9  }
   0x8   : > { %p33_p0 = scmp.ge.s32.totalorder %s31_s16, 2  ;;  %s40_s17 = sadd.s32 1, %s743_s11 }
   0x9   : > { %p47_p1 = scmp.ne.s32.totalorder %s743_s11, %s739_s10  ;;  %p48_p2 = scmp.eq.s32.totalorder %s755_s14, 0 }
   0xa   : > { %s965_s16 = smov (%p33_p0, %s31_s16), 0  ;;  %p53_p4 = scmp.ne.s32.totalorder %s739_s10, %s735_s9 }
   0xb   : > { %p815_p3 = por %p48_p2, %p47_p1  ;;  %s35_s19 = ssub.s32 %s751_s13, %s965_s16 }
   0xc   : > { %p54_p5 = scmp.eq.s32.totalorder %s506_s15, 0  ;;  %p38_p6 = scmp.eq.s32.totalorder %s35_s19, 0 }
   0xd   : > { %p541_p8 = scmp.lt.s32.totalorder %s755_s14, 2  ;;  %s126_s22 = sand.u32 1, %s743_s11  }
   0xe   : > { %p824_p7 = por %p54_p5, %p53_p4  ;;  %s524_s23 = sshll.u32 %s751_s13, 3 }
   0xf   : > { %s830_s21 = scalar_select %p38_p6, %s743_s11, %s40_s17  }
  0x10   : > { %s509_s24 = sshll.u32 %s126_s22, 3  ;;  %s136_s27 = scalar_lea.hbm %s953_s0, %s524_s23 }
  0x11   : > { %s137_s28 = sshll.u32 %s136_s27, 4  ;;  %s130_s29 = scalar_lea.vmem [#allocation2], %s509_s24  ;;  %s138_s28 = int_to_ptr.hbm [resolvable:$true] %s137_s28 }
  0x12   : > { %s139_s30 = sshll.u32 %s130_s29, 4  ;;  %p839_p9 = pnand %p541_p8, %p815_p3  ;;  %s140_s30 = int_to_ptr.vmem [resolvable:$true] %s139_s30 }
  0x13   : > { %p512_p10 = scmp.ge.s32.totalorder %s755_s14, 1  ;;  %p165_p11 = scmp.lt.s32.totalorder %s755_s14, 3 }
  0x14   : > { %s127_s4 = scalar_lea.sflag [#allocation3], %s126_s22  ;;  %s757_s5 = smov 32  }
  0x15   : > { %s758_s6 = smov 2   ;;  %p166_p12 = pnand %p512_p10, %p165_p11 }
  0x16   : > { %537 = dma.hbm_to_vmem [thread:$0]  (!%p839_p9), %s138_s28, 128, %s140_s30, %s127_s4, %s757_s5, %s757_s5, %s758_s6  }
  0x17   : > { %s156_s9 = scalar_lea.hbm %s954_s1, %s751_s13  ;;  %s152_s18 = scalar_lea.vmem [#allocation5], %s126_s22 }
  0x18   : > { %s158_s17 = sshll.u32 %s156_s9, 4  ;;  %s160_s19 = sshll.u32 %s152_s18, 4  ;;  %s159_s17 = int_to_ptr.hbm [resolvable:$true] %s158_s17  ;;  %s161_s19 = int_to_ptr.vmem [resolvable:$true] %s160_s19 }
  0x19   : > { %s150_s23 = scalar_lea.sflag [#allocation6], %s126_s22  ;;  %169 = sbr.rel (%p166_p12) target bundleno = 114 (0x72), region = 28 }
  0x1a   : > { %540 = dma.hbm_to_vmem [thread:$0]  (!%p839_p9), %s159_s17, 16, %s161_s19, %s150_s23  }
  0x1b   : > { %s854_s24 = sand.u32 (!%p166_p12), 1, %s739_s10  }
  0x1c   : > { %s513_s25 = sshll.u32 (!%p166_p12), %s854_s24, 3  ;;  %s172_s26 = scalar_lea.sflag (!%p166_p12), [#allocation3], %s854_s24 }
  0x1d   : > { %s175_s27 = scalar_lea.vmem (!%p166_p12), [#allocation2], %s513_s25 }
  0x1e   : > { %722 = dma.done.wait (%p824_p7), %s172_s26, 128  }
  0x1f   : > { %724 = vsyncadd (%p824_p7), %s172_s26, 4294967168  ;;  %s182_s22 = scalar_lea.sflag [#allocation6], %s854_s24  ;;  %s184_s28 = scalar_lea.vmem [#allocation5], %s854_s24 }
  0x20   : > { %726 = dma.done.wait (%p824_p7), %s182_s22, 16  }
  0x21   : > { %728 = vsyncadd (%p824_p7), %s182_s22, 4294967280  ;;  %p205_p13 = scmp.eq.s32.totalorder %s747_s12, 0 }
  0x22   : > { %v759_v0 = vmov (%p205_p13), 0.0  }
  0x23   : > { %210 = sbr.rel (!%p205_p13) target bundleno = 40 (0x28), region = 40  ;;  %211 = vst [vmem:[#allocation7] sm:$0xf] (%p205_p13), %v759_v0 }
  0x24   : > { %212 = vst [vmem:[#allocation7 + $0x4] sm:$0xf] (%p205_p13), %v759_v0 }
  0x25   : > { %213 = vst [vmem:[#allocation7 + $0x8] sm:$0xf] (%p205_p13), %v759_v0 }
  0x28 PF: > { %v214_v1 = vld [vmem:[%s175_s27] sm:$0x3]  ;;  %v215_v2 = vld [vmem:[%s175_s27 + $0x2] sm:$0x3]  ;;  %v216_v3 = vld [vmem:[%s175_s27 + $0x4] sm:$0x3] }
  0x29   : > { %v217_v4 = vld [vmem:[%s175_s27 + $0x6] sm:$0x3]  ;;  %vm220_vm0 = vcmask 1041408   ;;  %v218_v12 = vld [vmem:[%s184_s28] sm:$0x1]  ;;  %v760_v22 = vmov 0.0  }
  0x2a   : > { %v221_v5 = vsel %vm220_vm0, %v214_v1, -inf  ;;  %v222_v6 = vsel %vm220_vm0, %v215_v2, -inf  ;;  %v223_v7 = vsel %vm220_vm0, %v216_v3, -inf  ;;  %v224_v8 = vsel %vm220_vm0, %v217_v4, -inf  ;;  %s761_s12 = smov [#allocation7]   ;;  %s421_s3 = sshll.u32 %s955_s2, 4  ;;  %s422_s3 = int_to_ptr.hbm [resolvable:$true] %s421_s3 }
  0x2b   : > { %v225_v9 = vmax.f32 %v221_v5, %v222_v6  ;;  %v226_v10 = vmax.f32 %v223_v7, %v224_v8  ;;  %v873_v17 = vunpack.c.0.s8 %v218_v12  ;;  %vm325_vm5 = vcmask 1041409   ;;  %s419_s20 = sshll.u32 %s761_s12, 4  ;;  %p542_p0 = scmp.eq.s32.totalorder %s506_s15, 1  ;;  %s420_s20 = int_to_ptr.vmem [resolvable:$true] %s419_s20 }
  0x2c   : > { %vm327_vm6 = vcmask 1042434   ;;  %vm329_vm7 = vcmask 1043459   ;;  %s762_s4 = smov 64   ;;  %s763_s5 = smov 4  }
  0x2d   : > { %v227_v11 = vmax.f32 %v225_v9, %v226_v10  ;;  %vm265_vm1 = vcmp.eq.s32.totalorder %v873_v17, 0  ;;  %vm266_vm2 = vcmp.eq.s32.totalorder %v873_v17, 1  ;;  %vm267_vm3 = vcmp.eq.s32.totalorder %v873_v17, 2 }
  0x2e   : > { %vm268_vm4 = vcmp.eq.s32.totalorder %v873_v17, 3  ;;  %v880_v23 = vsel %vm265_vm1, 1.0, %v760_v22  ;;  %v883_v24 = vsel %vm266_vm2, 1.0, %v760_v22  ;;  %v888_v26 = vsel %vm267_vm3, 1.0, %v760_v22 }
  0x2f   : > { %v228_v13 = vsub.f32 %v214_v1, %v227_v11  ;;  %v229_v14 = vsub.f32 %v215_v2, %v227_v11  ;;  %v230_v15 = vsub.f32 %v216_v3, %v227_v11  ;;  %v231_v16 = vsub.f32 %v217_v4, %v227_v11  ;;  %v335_v3 = vld [vmem:[#allocation7 + $0x4] sm:$0xf] }
  0x30   : > { %v891_v27 = vsel %vm268_vm4, 1.0, %v760_v22  ;;  %v336_v28 = vsel %vm220_vm0, %v880_v23, 0.0  ;;  %v343_v29 = vsel %vm220_vm0, %v883_v24, 0.0  ;;  %v350_v34 = vsel %vm220_vm0, %v888_v26, 0.0 }
  0x31   : > { %v232_v18 = vmul.f32 1.442695, %v228_v13  ;;  %v234_v19 = vmul.f32 1.442695, %v229_v14  ;;  %v236_v20 = vmul.f32 1.442695, %v230_v15 }
  0x32   : > { %v238_v21 = vmul.f32 1.442695, %v231_v16  ;;  %v337_v32 = vrot.slane %v336_v28, 4  ;;  %v344_v33 = vrot.slane %v343_v29, 4  ;;  %v351_v37 = vrot.slane %v350_v34, 4 }
  0x33   : > { %599 = vpow2.f32 %v232_v18  ;;  %v357_v38 = vsel %vm220_vm0, %v891_v27, 0.0  ;;  %vm281_vm12 = vcmp.ge.s32.totalorder %v873_v17, 0 }
  0x34   : > { %601 = vpow2.f32 %v234_v19  ;;  %v338_v42 = vadd.f32 %v337_v32, %v336_v28  ;;  %v345_v43 = vadd.f32 %v344_v33, %v343_v29  ;;  %v352_v45 = vadd.f32 %v351_v37, %v350_v34 }
  0x35   : > { %603 = vpow2.f32 %v236_v20  ;;  %v358_v46 = vrot.slane %v357_v38, 4  ;;  %v519_v28 = vsel %vm281_vm12, 1.0, %v760_v22 }
  0x36   : > { %605 = vpow2.f32 %v238_v21  ;;  %v339_v48 = vrot.slane %v338_v42, 2  ;;  %v346_v49 = vrot.slane %v345_v43, 2  ;;  %v353_v50 = vrot.slane %v352_v45, 2 }
  0x37   : > { %v359_v51 = vadd.f32 %v358_v46, %v357_v38 }
  0x38   : > { %v340_v53 = vadd.f32 %v339_v48, %v338_v42  ;;  %v347_v54 = vadd.f32 %v346_v49, %v345_v43  ;;  %v354_v55 = vadd.f32 %v353_v50, %v352_v45 }
  0x39   : > { %v885_v25 = vpop.eup %599  ;;  %v360_v56 = vrot.slane %v359_v51, 2 }
  0x3a   : > { %v602_v30 = vpop.eup %601  ;;  %v240_v31 = vsel %vm220_vm0, %v885_v25, 0.0  ;;  %v341_v57 = vrot.slane %v340_v53, 1  ;;  %v348_v58 = vrot.slane %v347_v54, 1  ;;  %v355_v59 = vrot.slane %v354_v55, 1 }
  0x3b   : > { %v604_v35 = vpop.eup %603  ;;  %v241_v36 = vsel %vm220_vm0, %v602_v30, 0.0  ;;  %v361_v60 = vadd.f32 %v360_v56, %v359_v51 }
  0x3c   : > { %v606_v39 = vpop.eup %605  ;;  %v242_v40 = vadd.f32 %v241_v36, %v240_v31  ;;  %v243_v41 = vsel %vm220_vm0, %v604_v35, 0.0  ;;  %v342_v61 = vadd.f32 %v341_v57, %v340_v53  ;;  %v349_v62 = vadd.f32 %v348_v58, %v347_v54 }
  0x3d   : > { %v245_v44 = vsel %vm220_vm0, %v606_v39, 0.0  ;;  %v356_v63 = vadd.f32 %v355_v59, %v354_v55  ;;  %v362_v0 = vrot.slane %v361_v60, 1 }
  0x3e   : > { %v244_v47 = vadd.f32 %v243_v41, %v242_v40  ;;  %v368_v1 = vsel %vm325_vm5, %v349_v62, %v342_v61 }
  0x3f   : > { %v363_v4 = vadd.f32 %v362_v0, %v361_v60  ;;  %v369_v5 = vsel %vm327_vm6, %v356_v63, %v368_v1 }
  0x40   : > { %v246_v52 = vadd.f32 %v245_v44, %v244_v47 }
  0x41   : > { %v370_v8 = vsel %vm329_vm7, %v363_v4, %v369_v5 }
  0x42   : > { %607 = vrcp.f32 %v246_v52  ;;  %vm252_vm8 = vweird.f32 %v246_v52  ;;  %v258_v7 = vand.u32 2147483648, %v246_v52  ;;  %v256_v10 = vand.u32 2147483647, %v246_v52 }
  0x43   : > { %v372_v11 = vadd.f32 %v370_v8, %v335_v3 }
  0x44   : > { %v259_v13 = vor.u32 1.1754944e-38, %v258_v7  ;;  %vm257_vm11 = vcmp.eq.f32.partialorder %v256_v10, 8.507059e+37 }
  0x45   : > { %373 = vst [vmem:[#allocation7 + $0x4] sm:$0xf] %v372_v11 }
  0x48   : > { %v608_v2 = vpop.eup %607 }
  0x49   : > { %v248_v6 = vmul.f32 %v608_v2, %v246_v52  ;;  %vm253_vm9 = vweird.f32 %v608_v2 }
  0x4a   : > { %vm254_vm10 = vmor %vm252_vm8, %vm253_vm9 }
  0x4b   : > { %v249_v9 = vsub.f32 1.0, %v248_v6 }
  0x4d   : > { %v250_v12 = vmul.f32 %v608_v2, %v249_v9 }
  0x4f   : > { %v251_v14 = vadd.f32 %v608_v2, %v250_v12 }
  0x51   : > { %v255_v15 = vsel %vm254_vm10, %v608_v2, %v251_v14 }
  0x52   : > { %v260_v16 = vsel %vm257_vm11, %v259_v13, %v255_v15 }
  0x53   : > { %v261_v18 = vmul.f32 %v885_v25, %v260_v16  ;;  %v262_v19 = vmul.f32 %v602_v30, %v260_v16  ;;  %v263_v20 = vmul.f32 %v604_v35, %v260_v16  ;;  %v264_v21 = vmul.f32 %v606_v39, %v260_v16 }
  0x55   : > { %v289_v29 = vmul.f32 %v880_v23, %v261_v18  ;;  %v290_v31 = vmul.f32 %v883_v24, %v262_v19  ;;  %v291_v32 = vmul.f32 %v888_v26, %v263_v20  ;;  %v292_v33 = vmul.f32 %v891_v27, %v264_v21 }
  0x56   : > { %v277_v34 = vmul.f32 %v261_v18, %v261_v18  ;;  %v278_v36 = vmul.f32 %v262_v19, %v262_v19  ;;  %v279_v37 = vmul.f32 %v263_v20, %v263_v20  ;;  %v280_v17 = vmul.f32 %v264_v21, %v264_v21  ;;  %v288_v19 = vld [vmem:[#allocation7] sm:$0xf] }
  0x57   : > { %v293_v38 = vsel %vm220_vm0, %v289_v29, 0.0  ;;  %v300_v25 = vsel %vm220_vm0, %v290_v31, 0.0  ;;  %v307_v30 = vsel %vm220_vm0, %v291_v32, 0.0  ;;  %v314_v22 = vsel %vm220_vm0, %v292_v33, 0.0 }
  0x58   : > { %v294_v35 = vrot.slane %v293_v38, 4  ;;  %v301_v23 = vrot.slane %v300_v25, 4  ;;  %v308_v39 = vrot.slane %v307_v30, 4  ;;  %v315_v24 = vrot.slane %v314_v22, 4 }
  0x59   : > { %v284_v40 = vmul.f32 %v519_v28, %v277_v34  ;;  %v285_v26 = vmul.f32 %v519_v28, %v278_v36  ;;  %v286_v41 = vmul.f32 %v519_v28, %v279_v37  ;;  %v287_v27 = vmul.f32 %v519_v28, %v280_v17 }
  0x5a   : > { %v295_v42 = vadd.f32 %v294_v35, %v293_v38  ;;  %v302_v43 = vadd.f32 %v301_v23, %v300_v25  ;;  %v309_v44 = vadd.f32 %v308_v39, %v307_v30  ;;  %v316_v45 = vadd.f32 %v315_v24, %v314_v22  ;;  %v375_v25 = vld [vmem:[#allocation7 + $0x8] sm:$0xf] }
  0x5b   : > { %v376_v46 = vsel %vm220_vm0, %v284_v40, 0.0  ;;  %v383_v47 = vsel %vm220_vm0, %v285_v26, 0.0  ;;  %v390_v48 = vsel %vm220_vm0, %v286_v41, 0.0  ;;  %v397_v49 = vsel %vm220_vm0, %v287_v27, 0.0 }
  0x5c   : > { %v296_v50 = vrot.slane %v295_v42, 2  ;;  %v303_v51 = vrot.slane %v302_v43, 2  ;;  %v310_v52 = vrot.slane %v309_v44, 2  ;;  %v317_v53 = vrot.slane %v316_v45, 2 }
  0x5d   : > { %v377_v54 = vrot.slane %v376_v46, 4  ;;  %v384_v55 = vrot.slane %v383_v47, 4  ;;  %v391_v56 = vrot.slane %v390_v48, 4  ;;  %v398_v57 = vrot.slane %v397_v49, 4 }
  0x5e   : > { %v297_v58 = vadd.f32 %v296_v50, %v295_v42  ;;  %v304_v59 = vadd.f32 %v303_v51, %v302_v43  ;;  %v311_v60 = vadd.f32 %v310_v52, %v309_v44  ;;  %v318_v61 = vadd.f32 %v317_v53, %v316_v45 }
  0x5f   : > { %v378_v62 = vadd.f32 %v377_v54, %v376_v46  ;;  %v385_v63 = vadd.f32 %v384_v55, %v383_v47  ;;  %v392_v0 = vadd.f32 %v391_v56, %v390_v48  ;;  %v399_v1 = vadd.f32 %v398_v57, %v397_v49 }
  0x60   : > { %v298_v2 = vrot.slane %v297_v58, 1  ;;  %v305_v3 = vrot.slane %v304_v59, 1  ;;  %v312_v4 = vrot.slane %v311_v60, 1  ;;  %v319_v5 = vrot.slane %v318_v61, 1 }
  0x61   : > { %v379_v6 = vrot.slane %v378_v62, 2  ;;  %v386_v7 = vrot.slane %v385_v63, 2  ;;  %v393_v8 = vrot.slane %v392_v0, 2  ;;  %v400_v9 = vrot.slane %v399_v1, 2 }
  0x62   : > { %v299_v10 = vadd.f32 %v298_v2, %v297_v58  ;;  %v306_v11 = vadd.f32 %v305_v3, %v304_v59  ;;  %v313_v12 = vadd.f32 %v312_v4, %v311_v60  ;;  %v320_v13 = vadd.f32 %v319_v5, %v318_v61 }
  0x63   : > { %v380_v14 = vadd.f32 %v379_v6, %v378_v62  ;;  %v387_v15 = vadd.f32 %v386_v7, %v385_v63  ;;  %v394_v16 = vadd.f32 %v393_v8, %v392_v0  ;;  %v401_v18 = vadd.f32 %v400_v9, %v399_v1 }
  0x64   : > { %v326_v20 = vsel %vm325_vm5, %v306_v11, %v299_v10 }
  0x65   : > { %v328_v21 = vsel %vm327_vm6, %v313_v12, %v326_v20  ;;  %v381_v28 = vrot.slane %v380_v14, 1  ;;  %v388_v29 = vrot.slane %v387_v15, 1  ;;  %v395_v31 = vrot.slane %v394_v16, 1 }
  0x66   : > { %v330_v32 = vsel %vm329_vm7, %v320_v13, %v328_v21  ;;  %v402_v33 = vrot.slane %v401_v18, 1 }
  0x67   : > { %v332_v34 = vadd.f32 %v330_v32, %v288_v19  ;;  %v382_v36 = vadd.f32 %v381_v28, %v380_v14  ;;  %v389_v37 = vadd.f32 %v388_v29, %v387_v15  ;;  %v396_v17 = vadd.f32 %v395_v31, %v394_v16 }
  0x68   : > { %v403_v38 = vadd.f32 %v402_v33, %v401_v18 }
  0x69   : > { %333 = vst [vmem:[#allocation7] sm:$0xf] %v332_v34  ;;  %v408_v30 = vsel %vm325_vm5, %v389_v37, %v382_v36 }
  0x6a   : > { %v409_v22 = vsel %vm327_vm6, %v396_v17, %v408_v30 }
  0x6b   : > { %v410_v35 = vsel %vm329_vm7, %v403_v38, %v409_v22 }
  0x6c   : > { %v412_v23 = vadd.f32 %v410_v35, %v375_v25 }
  0x6e   : > { %413 = vst [vmem:[#allocation7 + $0x8] sm:$0xf] %v412_v23 }
  0x6f   : > { %531 = dma.vmem_to_hbm [thread:$0]  (%p542_p0), %s420_s20, 192, %s422_s3, [#allocation4], %s762_s4, %s762_s4, %s763_s5  }
  0x70   : > { %730 = dma.done.wait (%p542_p0), [#allocation4], 192  }
  0x71   : > { %732 = vsyncadd (%p542_p0), [#allocation4], 4294967104 }
  0x72 PF: > { %s19_s14 = sadd.s32 1, %s755_s14   ;;  %s959_s9 = smov %s739_s10 }
  0x73   : > { %p16_p1 = scmp.ge.s32.totalorder %s19_s14, 4   ;;  %s960_s10 = smov %s743_s11 }
  0x74   : > { %s961_s11 = smov %s830_s21  ;;  %s962_s12 = smov %s751_s13 }
  0x75   : > { %s963_s13 = smov %s965_s16  ;;  %18 = sbr.rel (!%p16_p1) target bundleno = 7 (0x7), region = 84 }
  0x7a   :  { %438 = vsyncpa [#allocation3], 1 }
  0x7b   :  { %440 = vsyncpa [#allocation3 + $0x1], 1 }
  0x7c   :  { %441 = vsyncpa [#allocation6], 1 }
  0x7d   :  { %443 = vsyncpa [#allocation6 + $0x1], 1 }
  0x7e   :  { %444 = vsyncpa [#allocation4], 1 }
  0x7f   :  { %446 = vsyncpa [#allocation4 + $0x1], 1 }

</bundles_post_ra>
